<compile_context>
chip_gen: v6e
topology: v6e:2x2x1
jax: 0.10.0
libtpu: 0.0.40
codegen_flags: <defaults>
</compile_context>

<pallas_src>
import jax
import jax.numpy as jnp
from jax.experimental import pallas as pl
from jax.experimental.pallas import tpu as pltpu


def _bias_add_kernel(bias_ref, x_ref, o_ref):
    # bias_ref: (1,) f32 scalar in SMEM; x_ref / o_ref: (tm, lane) VMEM tiles.
    b = bias_ref[0].astype(x_ref.dtype)
    o_ref[...] = (x_ref[...] + b).astype(o_ref.dtype)


def _round_up(a, b):
    return ((a + b - 1) // b) * b


def bias_explicit_forward(x, explicit_bias):
    """x: arbitrary-shape float array; explicit_bias: scalar/(1,) f32. Returns x + bias."""
    orig_shape = x.shape
    dtype = x.dtype
    itemsize = dtype.itemsize
    total = x.size

    # Robust to 0-d / (1,) / other scalar-like parameter shapes.
    bias = jnp.asarray(explicit_bias, dtype=jnp.float32).reshape(1)

    # --- lane-dense 2D view of the flattened tensor, with NO data movement ---
    # Widest lane count (multiple of 128) dividing the element count -> the
    # reshape is metadata-only (no pad copy, no tail-slice copy on readback).
    lane = None
    for cand in (512, 256, 128):
        if total % cand == 0:
            lane = cand
            break

    flat = x.reshape(-1)
    pad = 0
    if lane is None:
        # TODO(synk): ragged sizes (total % 128 != 0) still pay one pad copy +
        # tail slice; the real fix is fusing this add into a neighbor's epilogue.
        lane = 128
        pad = (-total) % lane
        flat = jnp.concatenate([flat, jnp.zeros((pad,), dtype=dtype)])

    rows = (total + pad) // lane
    x2d = flat.reshape(rows, lane)

    # --- row tiling ---
    # ~4 MiB per input buffer (in + out, double-buffered => ~16 MiB VMEM: fits
    # every generation incl. v7x), and aim for >=4 grid steps so pipelining and
    # dual-TC sharding on v7x never degenerate to a single block.
    max_tile_bytes = 4 * 1024 * 1024
    max_tm = max(8, (max_tile_bytes // (lane * itemsize)) // 8 * 8)
    tm = min(max_tm, _round_up(pl.cdiv(rows, 4), 8))
    if tm >= rows:
        tm = rows  # tiny input: one full-extent block (legal even if rows % 8 != 0)
    grid = (pl.cdiv(rows, tm),)

    out2d = pl.pallas_call(
        _bias_add_kernel,
        out_shape=jax.ShapeDtypeStruct((rows, lane), dtype),
        grid=grid,
        in_specs=[
            pl.BlockSpec(memory_space=pltpu.SMEM),        # scalar bias, untiled, SMEM
            pl.BlockSpec((tm, lane), lambda i: (i, 0)),   # lane-dense VMEM tiles
        ],
        out_specs=pl.BlockSpec((tm, lane), lambda i: (i, 0)),
        compiler_params=pltpu.CompilerParams(
            dimension_semantics=("parallel",),            # row loop is fully parallel
            vmem_limit_bytes=32 * 1024 * 1024,            # v5e default scoped limit is 16 MiB
        ),
        # NOTE: if the caller donates x, add input_output_aliases={1: 0} to reuse
        # x's HBM allocation; without donation XLA would insert a defensive copy,
        # so it is intentionally left off here.
    )(bias, x2d)

    out_flat = out2d.reshape(-1)
    if pad:
        out_flat = out_flat[:total]
    return out_flat.reshape(orig_shape)


if __name__ == "__main__":
    key = jax.random.PRNGKey(0)
    x = jax.random.normal(key, (2, 4, 16, 16), dtype=jnp.float32)

    # Parameter initialized exactly as in the PyTorch module: zeros(1)
    explicit_bias = jnp.zeros((1,), dtype=jnp.float32)

    out = jax.block_until_ready(bias_explicit_forward(x, explicit_bias))
    assert out.shape == x.shape and out.dtype == x.dtype
    assert jnp.allclose(out, x + explicit_bias[0], atol=1e-6)

    # Exercise a non-zero bias and a ragged (non-multiple-of-128) size too.
    bias2 = jnp.full((1,), 0.5, dtype=jnp.float32)
    out2 = jax.block_until_ready(bias_explicit_forward(x, bias2))
    assert jnp.allclose(out2, x + 0.5, atol=1e-6)

    x3 = jax.random.normal(jax.random.PRNGKey(1), (3, 5, 7), dtype=jnp.float32)
    out3 = jax.block_until_ready(bias_explicit_forward(x3, bias2))
    assert out3.shape == x3.shape
    assert jnp.allclose(out3, x3 + 0.5, atol=1e-6)

    print("KERNEL_OK")
</pallas_src>

<mosaic_0001>
module attributes {stable_mosaic.version = 11 : i64} {
  func.func @_bias_add_kernel(%arg0: i32, %arg1: memref<1xf32, #tpu.memory_space<smem>>, %arg2: memref<4x512xf32, #tpu.memory_space<vmem>>, %arg3: memref<4x512xf32, #tpu.memory_space<vmem>>) attributes {dimension_semantics = [#tpu.dimension_semantics<parallel>], iteration_bounds = array<i64: 1>, scalar_prefetch = 0 : i64, scratch_operands = 0 : i64, tpu.core_type = #tpu.core_type<tc>, window_params = [{transform_indices = @transform_0, window_bounds = array<i64: 1>}, {transform_indices = @transform_1, window_bounds = array<i64: 4, 512>}, {transform_indices = @transform_2, window_bounds = array<i64: 4, 512>}]} {
    %c0 = arith.constant 0 : index
    %0 = memref.load %arg1[%c0] : memref<1xf32, #tpu.memory_space<smem>>
    %c0_0 = arith.constant 0 : index
    %c0_1 = arith.constant 0 : index
    %1 = vector.load %arg2[%c0_0, %c0_1] : memref<4x512xf32, #tpu.memory_space<vmem>>, vector<4x512xf32>
    %2 = vector.broadcast %0 : f32 to vector<4x512xf32>
    %3 = arith.addf %1, %2 : vector<4x512xf32>
    %c0_2 = arith.constant 0 : index
    %c0_3 = arith.constant 0 : index
    %4 = vector.load %arg3[%c0_2, %c0_3] : memref<4x512xf32, #tpu.memory_space<vmem>>, vector<4x512xf32>
    tpu.vector_store %arg3[%c0_2, %c0_3], %3 {strides = array<i32>} : memref<4x512xf32, #tpu.memory_space<vmem>>, vector<4x512xf32>,
    return
  }
  func.func @transform_0(%arg0: i32) -> i32 {
    %c0_i32 = arith.constant 0 : i32
    %c0_i32_0 = arith.constant 0 : i32
    return %c0_i32 : i32
  }
  func.func @transform_1(%arg0: i32) -> (i32, i32) {
    %c0_i32 = arith.constant 0 : i32
    %c0_i32_0 = arith.constant 0 : i32
    return %arg0, %c0_i32 : i32, i32
  }
  func.func @transform_2(%arg0: i32) -> (i32, i32) {
    %c0_i32 = arith.constant 0 : i32
    %c0_i32_0 = arith.constant 0 : i32
    return %arg0, %c0_i32 : i32, i32
  }
}

</mosaic_0001>

<bundles_post_ra>
// kernel: tpu_custom_call.1
= control target key start
LH: loop header
LB: loop body
LE: loop exit
PB: predicated region body
PF: predicated region fallthrough
CT: control target
= control target key end

     0   :  { %8 = vsyncpa [#allocation4], 0  ;;  %s120_s0 = inlined_call_operand.<no memory space> [shape: f32[1], index: 0, kind: input, shape index: {}]   ;;  %s121_s1 = inlined_call_operand.hbm [shape: f32[4,512], index: 1, kind: input, shape index: {}]   ;;  %s122_s2 = inlined_call_operand.hbm [shape: f32[4,512], index: 2, kind: output, shape index: {}]  }
   0x1   :  { %9 = vsyncpa [#allocation5], 0  ;;  %s94_s9 = smov [#allocation3]  }
   0x2   :  { %s18_s10 = sshll.u32 %s94_s9, 4  ;;  %s19_s10 = int_to_ptr.vmem [resolvable:$true] %s18_s10 }
   0x3   :  { %s58_s11 = scalar_lea.vmem %s19_s10, 256  ;;  %p63_p1 = scmp.lt.s32.totalorder %s19_s10, %s19_s10 }
   0x4   :  { %p59_p0 = scmp.ne.s32.totalorder %s19_s10, %s58_s11  ;;  %p64_p2 = scmp.lt.s32.totalorder %s58_s11, %s58_s11 }
   0x6   :  { %p65_p3 = por %p64_p2, %p63_p1 }
   0x8   :  { %p66_p4 = pnand %p65_p3, %p59_p0 }
   0xa   :  { %69 = shalt.err (!%p66_p4)
}
   0xb   :  { %21 = dma.hbm_to_vmem [thread:$0]  %s121_s1, 256, %s19_s10, [#allocation4]  }
   0xc   :  { %90 = dma.done.wait [#allocation4], 256  }
   0xd   :  { %91 = vsyncadd [#allocation4], 4294967040  ;;  %v28_v0 = vstv %s120_s0  ;;  %s95_s16 = smov [#allocation6]   ;;  %v26_v1 = vld [vmem:[#allocation3] sm:$0xff]  ;;  %v27_v2 = vld [vmem:[#allocation3 + $0x8] sm:$0xff] }
   0xe   :  { %s39_s17 = sshll.u32 %s95_s16, 4  ;;  %v29_v3 = vadd.f32 %v28_v0, %v26_v1  ;;  %v30_v4 = vadd.f32 %v28_v0, %v27_v2  ;;  %s40_s17 = int_to_ptr.vmem [resolvable:$true] %s39_s17 }
   0xf   :  { %s70_s18 = scalar_lea.vmem %s40_s17, 256  ;;  %p75_p6 = scmp.lt.s32.totalorder %s40_s17, %s40_s17 }
  0x10   :  { %31 = vst [vmem:[#allocation6] sm:$0xff] %v29_v3  ;;  %32 = vst [vmem:[#allocation6 + $0x8] sm:$0xff] %v30_v4  ;;  %p71_p5 = scmp.ne.s32.totalorder %s40_s17, %s70_s18  ;;  %p76_p7 = scmp.lt.s32.totalorder %s70_s18, %s70_s18 }
  0x12   :  { %p77_p8 = por %p76_p7, %p75_p6 }
  0x14   :  { %p78_p9 = pnand %p77_p8, %p71_p5 }
  0x16   :  { %81 = shalt.err (!%p78_p9)
}
  0x17   :  { %42 = dma.vmem_to_hbm [thread:$0]  %s40_s17, 256, %s122_s2, [#allocation5]  }
  0x18   :  { %92 = dma.done.wait [#allocation5], 256  }
  0x19   :  { %93 = vsyncadd [#allocation5], 4294967040 }
  0x1a   :  { %46 = vsyncpa [#allocation4], 1 }
  0x1b   :  { %47 = vsyncpa [#allocation5], 1 }

</bundles_post_ra>
